<compile_context>
chip_gen: v7x
topology: tpu7x:2x2x1
jax: 0.10.0
libtpu: 0.0.40
codegen_flags: <defaults>
</compile_context>

<pallas_src>
import functools
import math

import jax
import jax.numpy as jnp
from jax.experimental import pallas as pl
from jax.experimental.pallas import tpu as pltpu


# ------------------------------- helpers ----------------------------------- #

_VMEM_LIMIT = 32 * 1024 * 1024  # explicit scoped-VMEM cap (fits v5e/v6e/v7x)


def _cp(n_axes=1):
    return pltpu.CompilerParams(
        dimension_semantics=("parallel",) * n_axes,
        vmem_limit_bytes=_VMEM_LIMIT,
    )


def _row_tile(M):
    """Largest row-tile (multiple of 8) dividing M, capped at 512."""
    for t in (512, 256, 128, 64, 32, 16, 8):
        if M % t == 0:
            return t
    return M


def _ln_core(x, g, b, relu, eps):
    mean = jnp.mean(x, axis=-1, keepdims=True)
    var = jnp.mean(jnp.square(x - mean), axis=-1, keepdims=True)
    y = (x - mean) * jax.lax.rsqrt(var + eps)
    y = y * g + b
    if relu:
        y = jnp.maximum(y, 0.0)
    return y


# ----------------------------- Pallas kernels ------------------------------ #

def _linear_kernel(x_ref, w_ref, b_ref, o_ref, *, relu):
    acc = jnp.dot(x_ref[...], w_ref[...], preferred_element_type=jnp.float32)
    acc = acc + b_ref[...]
    if relu:
        acc = jnp.maximum(acc, 0.0)
    o_ref[...] = acc.astype(o_ref.dtype)


def linear(x, w, b, relu=False):
    M, K = x.shape
    N = w.shape[1]
    tm = _row_tile(M)
    return pl.pallas_call(
        functools.partial(_linear_kernel, relu=relu),
        out_shape=jax.ShapeDtypeStruct((M, N), x.dtype),
        grid=(M // tm,),
        in_specs=[
            pl.BlockSpec((tm, K), lambda i: (i, 0)),
            pl.BlockSpec((K, N), lambda i: (0, 0)),
            pl.BlockSpec((1, N), lambda i: (0, 0)),
        ],
        out_specs=pl.BlockSpec((tm, N), lambda i: (i, 0)),
        compiler_params=_cp(1),
    )(x, w, b.reshape(1, N))


def _proj_res_ln_kernel(a_ref, w_ref, b_ref, r_ref, g_ref, be_ref, o_ref, *, eps):
    # LN(residual + a @ W + b)   -- fused output projection + residual + LayerNorm
    y = jnp.dot(a_ref[...], w_ref[...], preferred_element_type=jnp.float32)
    y = y + b_ref[...] + r_ref[...].astype(jnp.float32)
    o_ref[...] = _ln_core(y, g_ref[...], be_ref[...], False, eps).astype(o_ref.dtype)


def proj_res_ln(a, w, b, residual, gamma, beta, eps=1e-5):
    M, K = a.shape
    N = w.shape[1]
    tm = _row_tile(M)
    return pl.pallas_call(
        functools.partial(_proj_res_ln_kernel, eps=eps),
        out_shape=jax.ShapeDtypeStruct((M, N), a.dtype),
        grid=(M // tm,),
        in_specs=[
            pl.BlockSpec((tm, K), lambda i: (i, 0)),
            pl.BlockSpec((K, N), lambda i: (0, 0)),
            pl.BlockSpec((1, N), lambda i: (0, 0)),
            pl.BlockSpec((tm, N), lambda i: (i, 0)),
            pl.BlockSpec((1, N), lambda i: (0, 0)),
            pl.BlockSpec((1, N), lambda i: (0, 0)),
        ],
        out_specs=pl.BlockSpec((tm, N), lambda i: (i, 0)),
        compiler_params=_cp(1),
    )(a, w, b.reshape(1, N), residual, gamma.reshape(1, N), beta.reshape(1, N))


def _ffn_res_ln_kernel(x_ref, w1_ref, b1_ref, w2_ref, b2_ref, g_ref, be_ref, o_ref,
                       *, eps):
    # LN(x + relu(x @ W1 + b1) @ W2 + b2)   -- fused two-matmul FFN + residual + LN
    x = x_ref[...]
    h = jnp.dot(x, w1_ref[...], preferred_element_type=jnp.float32) + b1_ref[...]
    h = jnp.maximum(h, 0.0)
    y = jnp.dot(h.astype(x.dtype), w2_ref[...],
                preferred_element_type=jnp.float32) + b2_ref[...]
    y = y + x.astype(jnp.float32)
    o_ref[...] = _ln_core(y, g_ref[...], be_ref[...], False, eps).astype(o_ref.dtype)


def ffn_res_ln(x, w1, b1, w2, b2, gamma, beta, eps=1e-5):
    M, D = x.shape
    DL = w1.shape[1]
    tm = _row_tile(M)
    return pl.pallas_call(
        functools.partial(_ffn_res_ln_kernel, eps=eps),
        out_shape=jax.ShapeDtypeStruct((M, D), x.dtype),
        grid=(M // tm,),
        in_specs=[
            pl.BlockSpec((tm, D), lambda i: (i, 0)),
            pl.BlockSpec((D, DL), lambda i: (0, 0)),
            pl.BlockSpec((1, DL), lambda i: (0, 0)),
            pl.BlockSpec((DL, D), lambda i: (0, 0)),
            pl.BlockSpec((1, D), lambda i: (0, 0)),
            pl.BlockSpec((1, D), lambda i: (0, 0)),
            pl.BlockSpec((1, D), lambda i: (0, 0)),
        ],
        out_specs=pl.BlockSpec((tm, D), lambda i: (i, 0)),
        compiler_params=_cp(1),
    )(x, w1, b1.reshape(1, DL), w2, b2.reshape(1, D),
      gamma.reshape(1, D), beta.reshape(1, D))


def _attn_kernel(qkv_ref, o_ref, *, heads, d_model, scale):
    # Per-batch block: qkv_ref is (1, S, 3D) fused QKV; heads sliced in-kernel so
    # the output store is lane-dense (full D width), no XLA head transposes.
    qkv = qkv_ref[0]                       # (S, 3D)
    S = qkv.shape[0]
    dh = d_model // heads
    row = jax.lax.broadcasted_iota(jnp.int32, (S, S), 0)
    col = jax.lax.broadcasted_iota(jnp.int32, (S, S), 1)
    causal = row >= col
    outs = []
    for h in range(heads):                 # static unroll, heads is small
        q = qkv[:, h * dh:(h + 1) * dh]
        k = qkv[:, d_model + h * dh:d_model + (h + 1) * dh]
        v = qkv[:, 2 * d_model + h * dh:2 * d_model + (h + 1) * dh]
        s = jnp.dot(q, k.T, preferred_element_type=jnp.float32) * scale
        s = jnp.where(causal, s, -1e30)
        m = jnp.max(s, axis=-1, keepdims=True)
        p = jnp.exp(s - m)
        l = jnp.sum(p, axis=-1, keepdims=True)
        p = p * pl.reciprocal(l, approx=True)          # EUP slot, not VALU
        outs.append(jnp.dot(p.astype(v.dtype), v,
                            preferred_element_type=jnp.float32))
    o_ref[0] = jnp.concatenate(outs, axis=-1).astype(o_ref.dtype)


def causal_attention(qkv, heads, d_model):
    B, S, D3 = qkv.shape
    scale = 1.0 / math.sqrt(d_model // heads)
    return pl.pallas_call(
        functools.partial(_attn_kernel, heads=heads, d_model=d_model, scale=scale),
        out_shape=jax.ShapeDtypeStruct((B, S, d_model), qkv.dtype),
        grid=(B,),
        in_specs=[pl.BlockSpec((1, S, D3), lambda i: (i, 0, 0))],
        out_specs=pl.BlockSpec((1, S, d_model), lambda i: (i, 0, 0)),
        compiler_params=_cp(1),
    )(qkv)


def _dconv_taps(x, ksize, dilation):
    """Build the (S, K*Cin) causally-shifted tap matrix in VMEM (no HBM pad)."""
    S = x.shape[0]
    row = jax.lax.broadcasted_iota(jnp.int32, (S, 1), 0)
    taps = []
    for k in range(ksize):
        shift = (ksize - 1 - k) * dilation       # out[t] uses x[t - shift]
        if shift == 0:
            taps.append(x)
        elif shift >= S:
            taps.append(jnp.zeros_like(x))
        else:
            xs = pltpu.roll(x, shift=shift, axis=0)
            taps.append(jnp.where(row >= shift, xs, 0.0))
    return jnp.concatenate(taps, axis=-1)        # lane-dense, K dim = K*Cin


def _dconv_ln_kernel(x_ref, w_ref, b_ref, g_ref, be_ref, o_ref,
                     *, dilation, ksize, eps):
    x = x_ref[0].astype(jnp.float32)
    xs = _dconv_taps(x, ksize, dilation)
    y = jnp.dot(xs, w_ref[...], preferred_element_type=jnp.float32) + b_ref[...]
    y = _ln_core(y, g_ref[...], be_ref[...], True, eps)
    o_ref[0] = y.astype(o_ref.dtype)


def _dconv_ln_res_kernel(x_ref, w_ref, b_ref, g_ref, be_ref, r_ref, o_ref,
                         *, dilation, ksize, eps):
    x = x_ref[0].astype(jnp.float32)
    xs = _dconv_taps(x, ksize, dilation)
    y = jnp.dot(xs, w_ref[...], preferred_element_type=jnp.float32) + b_ref[...]
    y = _ln_core(y, g_ref[...], be_ref[...], True, eps)
    o_ref[0] = (y + r_ref[0].astype(jnp.float32)).astype(o_ref.dtype)


def dconv_ln_relu(x, w, b, gamma, beta, dilation, residual=None, eps=1e-5):
    """Dilated causal conv (kernel K) fused with LayerNorm + ReLU (+ residual)."""
    B, S, Cin = x.shape
    K, _, Cout = w.shape
    wf = w.reshape(K * Cin, Cout)                 # taps stacked along matmul-K
    in_specs = [
        pl.BlockSpec((1, S, Cin), lambda i: (i, 0, 0)),
        pl.BlockSpec((K * Cin, Cout), lambda i: (0, 0)),
        pl.BlockSpec((1, Cout), lambda i: (0, 0)),
        pl.BlockSpec((1, Cout), lambda i: (0, 0)),
        pl.BlockSpec((1, Cout), lambda i: (0, 0)),
    ]
    args = [x, wf, b.reshape(1, Cout), gamma.reshape(1, Cout), beta.reshape(1, Cout)]
    if residual is None:
        kern = functools.partial(_dconv_ln_kernel, dilation=dilation, ksize=K, eps=eps)
    else:
        kern = functools.partial(_dconv_ln_res_kernel, dilation=dilation, ksize=K,
                                 eps=eps)
        in_specs.append(pl.BlockSpec((1, S, Cout), lambda i: (i, 0, 0)))
        args.append(residual)
    return pl.pallas_call(
        kern,
        out_shape=jax.ShapeDtypeStruct((B, S, Cout), x.dtype),
        grid=(B,),
        in_specs=in_specs,
        out_specs=pl.BlockSpec((1, S, Cout), lambda i: (i, 0, 0)),
        compiler_params=_cp(1),
    )(*args)


# --------------------------- candidate operations --------------------------- #

def apply_transformer(p, x):
    B, S, D = x.shape
    H = p["heads"]
    xf = x.reshape(B * S, D)
    qkv = linear(xf, p["Wqkv"], p["bqkv"])                  # fused QKV: (B*S, 3D)
    ah = causal_attention(qkv.reshape(B, S, 3 * D), H, D)   # (B, S, D), heads fused
    x1 = proj_res_ln(ah.reshape(B * S, D), p["Wo"], p["bo"], xf,
                     p["g1"], p["be1"])                     # LN(x + attn)
    x2 = ffn_res_ln(x1, p["W1"], p["bf1"], p["W2"], p["bf2"],
                    p["g2"], p["be2"])                      # LN(x + ffn)
    return x2.reshape(B, S, D)


def apply_nextitnet(p, x):
    d = p["dilation"]
    h = dconv_ln_relu(x, p["w1"], p["b1"], p["g1"], p["be1"], dilation=d)
    out = dconv_ln_relu(h, p["w2"], p["b2"], p["g2"], p["be2"], dilation=2 * d,
                        residual=x)                         # x + block(x)
    return out


def apply_op(op_params, x):
    if op_params["type"] == "transformer":
        return apply_transformer(op_params, x)
    return apply_nextitnet(op_params, x)


# ----------------------------- parameter setup ------------------------------ #

def _normal(key, shape, scale=0.02):
    return scale * jax.random.normal(key, shape, jnp.float32)


def init_transformer(key, d_layer, d_model, head):
    ks = jax.random.split(key, 4)
    z = lambda n: jnp.zeros((n,), jnp.float32)
    o = lambda n: jnp.ones((n,), jnp.float32)
    return {
        "type": "transformer", "heads": head,
        "Wqkv": _normal(ks[0], (d_model, 3 * d_model)), "bqkv": z(3 * d_model),
        "Wo": _normal(ks[1], (d_model, d_model)), "bo": z(d_model),
        "W1": _normal(ks[2], (d_model, d_layer)), "bf1": z(d_layer),
        "W2": _normal(ks[3], (d_layer, d_model)), "bf2": z(d_model),
        "g1": o(d_model), "be1": z(d_model),
        "g2": o(d_model), "be2": z(d_model),
    }


def init_nextitnet(key, d_layer, d_model, dilation):
    ks = jax.random.split(key, 2)
    z = lambda n: jnp.zeros((n,), jnp.float32)
    o = lambda n: jnp.ones((n,), jnp.float32)
    return {
        "type": "nextitnet", "dilation": dilation,
        "w1": _normal(ks[0], (3, d_model, d_layer)), "b1": z(d_layer),
        "g1": o(d_layer), "be1": z(d_layer),
        "w2": _normal(ks[1], (3, d_layer, d_model)), "b2": z(d_model),
        "g2": o(d_model), "be2": z(d_model),
    }


def init_supernet_params(key, num_block, layers_per_block, d_model, setting):
    attn_heads, dilations, d_layers = setting
    blocks = []
    for _b in range(num_block):
        layers = []
        for _l in range(layers_per_block):
            ops = []
            # same candidate-op ordering as MixOp.__init__
            for head in attn_heads:
                for dl in d_layers:
                    key, sub = jax.random.split(key)
                    ops.append(init_transformer(sub, dl, d_model, head))
            for dilation in dilations:
                for dl in d_layers:
                    key, sub = jax.random.split(key)
                    ops.append(init_nextitnet(sub, dl, d_model, dilation))
            layers.append(ops)
        blocks.append(layers)
    return {"blocks": blocks}


# ------------------------------ Supernet forward ---------------------------- #

def supernet_forward(params, x, start_block, forward_op):
    # stem is nn.Identity(); only the first block with index >= start_block runs.
    for i, block_layers in enumerate(params["blocks"]):
        if i < start_block:
            continue
        assert len(forward_op) == len(block_layers)
        for layer_ops, idx in zip(block_layers, forward_op):
            x = apply_op(layer_ops[idx], x)
        break
    return x


# ----------------------------------- main ----------------------------------- #

if __name__ == "__main__":
    B, S, D = 2, 8, 32
    setting = ([1, 2], [1, 2], [32, 64])   # (attn_heads, dilations, d_layer)
    num_block, layers_per_block = 2, 2

    x = jax.random.normal(jax.random.PRNGKey(0), (B, S, D), jnp.float32)
    params = init_supernet_params(jax.random.PRNGKey(42), num_block,
                                  layers_per_block, D, setting)

    # forward_op picks one candidate op per layer: idx 1 = Transformer(d_layer=64, head=1),
    # idx 5 = NextItNet(d_layer=64, dilation=1).
    out = supernet_forward(params, x, start_block=0, forward_op=[1, 5])
    jax.block_until_ready(out)
    assert out.shape == (B, S, D) and out.dtype == jnp.float32
    print("KERNEL_OK")
</pallas_src>

<mosaic_0001>
module attributes {stable_mosaic.version = 11 : i64} {
  func.func @_linear_kernel(%arg0: i32, %arg1: memref<16x32xf32, #tpu.memory_space<vmem>>, %arg2: memref<32x96xf32, #tpu.memory_space<vmem>>, %arg3: memref<1x96xf32, #tpu.memory_space<vmem>>, %arg4: memref<16x96xf32, #tpu.memory_space<vmem>>) attributes {dimension_semantics = [#tpu.dimension_semantics<parallel>], iteration_bounds = array<i64: 1>, scalar_prefetch = 0 : i64, scratch_operands = 0 : i64, tpu.core_type = #tpu.core_type<tc>, window_params = [{transform_indices = @transform_0, window_bounds = array<i64: 16, 32>}, {pipeline_mode = #tpu.pipeline_mode<synchronous>, transform_indices = @transform_1, window_bounds = array<i64: 32, 96>}, {pipeline_mode = #tpu.pipeline_mode<synchronous>, transform_indices = @transform_2, window_bounds = array<i64: 1, 96>}, {transform_indices = @transform_3, window_bounds = array<i64: 16, 96>}]} {
    %c0 = arith.constant 0 : index
    %c0_0 = arith.constant 0 : index
    %0 = vector.load %arg1[%c0, %c0_0] : memref<16x32xf32, #tpu.memory_space<vmem>>, vector<16x32xf32>
    %c0_1 = arith.constant 0 : index
    %c0_2 = arith.constant 0 : index
    %1 = vector.load %arg2[%c0_1, %c0_2] : memref<32x96xf32, #tpu.memory_space<vmem>>, vector<32x96xf32>
    %cst = arith.constant dense<0.000000e+00> : vector<16x96xf32>
    %2 = tpu.matmul %0, %1, %cst {dimension_numbers = #tpu.dot_dimension_numbers<[1], [0], [0], [1], [0, 0, 1, 1], [], []>} : vector<16x32xf32>, vector<32x96xf32>, vector<16x96xf32> -> vector<16x96xf32>
    %c0_3 = arith.constant 0 : index
    %c0_4 = arith.constant 0 : index
    %3 = vector.load %arg3[%c0_3, %c0_4] : memref<1x96xf32, #tpu.memory_space<vmem>>, vector<1x96xf32>
    %4 = vector.broadcast %3 : vector<1x96xf32> to vector<16x96xf32>
    %5 = arith.addf %2, %4 : vector<16x96xf32>
    %c0_5 = arith.constant 0 : index
    %c0_6 = arith.constant 0 : index
    %6 = vector.load %arg4[%c0_5, %c0_6] : memref<16x96xf32, #tpu.memory_space<vmem>>, vector<16x96xf32>
    tpu.vector_store %arg4[%c0_5, %c0_6], %5 {strides = array<i32>} : memref<16x96xf32, #tpu.memory_space<vmem>>, vector<16x96xf32>,
    return
  }
  func.func @transform_0(%arg0: i32) -> (i32, i32) {
    %c0_i32 = arith.constant 0 : i32
    %c0_i32_0 = arith.constant 0 : i32
    return %arg0, %c0_i32 : i32, i32
  }
  func.func @transform_1(%arg0: i32) -> (i32, i32) {
    %c0_i32 = arith.constant 0 : i32
    %c0_i32_0 = arith.constant 0 : i32
    %c0_i32_1 = arith.constant 0 : i32
    return %c0_i32, %c0_i32_0 : i32, i32
  }
  func.func @transform_2(%arg0: i32) -> (i32, i32) {
    %c0_i32 = arith.constant 0 : i32
    %c0_i32_0 = arith.constant 0 : i32
    %c0_i32_1 = arith.constant 0 : i32
    return %c0_i32, %c0_i32_0 : i32, i32
  }
  func.func @transform_3(%arg0: i32) -> (i32, i32) {
    %c0_i32 = arith.constant 0 : i32
    %c0_i32_0 = arith.constant 0 : i32
    return %arg0, %c0_i32 : i32, i32
  }
}

</mosaic_0001>

<bundles_post_ra>
// kernel: tpu_custom_call.1
= control target key start
LH: loop header
LB: loop body
LE: loop exit
PB: predicated region body
PF: predicated region fallthrough
CT: control target
= control target key end

     0   :  { %8 = vsyncpa [#allocation3], 0  ;;  %s337_s0 = inlined_call_operand.hbm [shape: f32[16,32], index: 0, kind: input, shape index: {}]   ;;  %s338_s1 = inlined_call_operand.hbm [shape: f32[32,96], index: 1, kind: input, shape index: {}]   ;;  %s339_s2 = inlined_call_operand.vmem [shape: f32[1,96], index: 2, kind: input, shape index: {}]   ;;  %s340_s3 = inlined_call_operand.hbm [shape: f32[16,96], index: 3, kind: output, shape index: {}]  }
   0x1   :  { %9 = vsyncpa [#allocation6], 0 }
   0x2   :  { %10 = vsyncpa [#allocation4], 0  ;;  %s264_s12 = smov [#allocation2]   ;;  %s192_s16 = scalar_lea.hbm %s337_s0, 256 }
   0x3   :  { %s16_s13 = sshll.u32 %s264_s12, 4  ;;  %p193_p0 = scmp.ne.s32.totalorder %s337_s0, %s192_s16  ;;  %s17_s13 = int_to_ptr.vmem [resolvable:$true] %s16_s13 }
   0x4   :  { %p196_p1 = scmp.lt.u32.totalorder %s192_s16, %s337_s0 }
   0x6   :  { %p198_p2 = pnand %p196_p1, %p193_p0 }
   0x8   :  { %201 = shalt.err (!%p198_p2)
}
   0x9   :  { %s202_s21 = scalar_lea.vmem %s17_s13, 256  ;;  %p207_p4 = scmp.lt.s32.totalorder %s17_s13, %s17_s13 }
   0xa   :  { %p203_p3 = scmp.ne.s32.totalorder %s17_s13, %s202_s21  ;;  %p208_p5 = scmp.lt.s32.totalorder %s202_s21, %s202_s21 }
   0xc   :  { %p209_p6 = por %p208_p5, %p207_p4 }
   0xe   :  { %p210_p7 = pnand %p209_p6, %p203_p3 }
  0x10   :  { %213 = shalt.err (!%p210_p7)
}
  0x11   :  { %s265_s22 = smov 128   ;;  %s266_s23 = smov 8  }
  0x12   :  { %22 = dma.hbm_to_vmem [thread:$0]  %s337_s0, 256, %s17_s13, [#allocation3], %s265_s22, %s265_s22, %s266_s23  }
  0x13   :  { %s267_s26 = smov [#allocation5]   ;;  %s214_s30 = scalar_lea.hbm %s338_s1, 512 }
  0x14   :  { %s28_s27 = sshll.u32 %s267_s26, 4  ;;  %p215_p8 = scmp.ne.s32.totalorder %s338_s1, %s214_s30  ;;  %s29_s27 = int_to_ptr.vmem [resolvable:$true] %s28_s27 }
  0x15   :  { %p218_p9 = scmp.lt.u32.totalorder %s214_s30, %s338_s1 }
  0x17   :  { %p220_p10 = pnand %p218_p9, %p215_p8 }
  0x19   :  { %223 = shalt.err (!%p220_p10)
}
  0x1a   :  { %s224_s8 = scalar_lea.vmem %s29_s27, 512  ;;  %p229_p12 = scmp.lt.s32.totalorder %s29_s27, %s29_s27 }
  0x1b   :  { %p225_p11 = scmp.ne.s32.totalorder %s29_s27, %s224_s8  ;;  %p230_p13 = scmp.lt.s32.totalorder %s224_s8, %s224_s8 }
  0x1d   :  { %p231_p0 = por %p230_p13, %p229_p12 }
  0x1f   :  { %p232_p1 = pnand %p231_p0, %p225_p11 }
  0x21   :  { %235 = shalt.err (!%p232_p1)
}
  0x22   :  { %34 = dma.hbm_to_vmem [thread:$0]  %s338_s1, 512, %s29_s27, [#allocation6], %s265_s22, %s265_s22, %s266_s23  }
  0x23   :  { %258 = dma.done.wait [#allocation3], 256  }
  0x24   :  { %259 = vsyncadd [#allocation3], 4294967040 }
  0x25   :  { %260 = dma.done.wait [#allocation6], 512  }
  0x26   :  { %261 = vsyncadd [#allocation6], 4294966784  ;;  %vm56_vm0 = vcmask 261120   ;;  %v45_v0 = vld [vmem:[#allocation5] sm:$0xff]  ;;  %v46_v1 = vld [vmem:[#allocation5 + $0x8] sm:$0xff]  ;;  %s268_s11 = smov [#allocation7]  }
  0x27   :  { %v47_v2 = vld [vmem:[#allocation5 + $0x10] sm:$0xff]  ;;  %v179_v3 = vpack.c.bf16 %v46_v1, %v45_v0  ;;  %v48_v4 = vld [vmem:[#allocation5 + $0x18] sm:$0xff]  ;;  %s146_s12 = sshll.u32 %s268_s11, 4  ;;  %vm138_vm1 = vcmask 785408   ;;  %s147_s12 = int_to_ptr.vmem [resolvable:$true] %s146_s12 }
  0x28   :  { %v43_v5 = vld [vmem:[#allocation2] sm:$0xff]  ;;  %v183_v6 = vpack.c.bf16 %v48_v4, %v47_v2  ;;  %v44_v7 = vld [vmem:[#allocation2 + $0x8] sm:$0xff]  ;;  %s236_s13 = scalar_lea.vmem %s147_s12, 256  ;;  %p241_p3 = scmp.lt.s32.totalorder %s147_s12, %s147_s12 }
  0x29   :  { %176 = vmatprep.mubr.msk.f32.mxu0 %vm56_vm0, %v43_v5  ;;  %180 = vmatprep.subr.bf16.mxu0 %v179_v3  ;;  %v159_v8 = vld [vmem:[%s339_s2] ss:$0 sm:$0xff]  ;;  %p237_p2 = scmp.ne.s32.totalorder %s147_s12, %s236_s13  ;;  %p242_p4 = scmp.lt.s32.totalorder %s236_s13, %s236_s13 }
  0x2a   :  { %182 = vmatpush3.bf16.msra.mxu0 %v179_v3 }
  0x2b   :  { %184 = vmatprep.subr.bf16.mxu0 %v183_v6  ;;  %p243_p5 = por %p242_p4, %p241_p3 }
  0x2d   :  { %p244_p6 = pnand %p243_p5, %p237_p2 }
  0x2e   :  { %186 = vmatpush3.bf16.msra.mxu0 %v183_v6 }
  0x31   :  { %177 = vmatmul.mubr.msk.f32.vlgmr.msra.gmra.mrb[0].mxu0 %vm56_vm0, %v44_v7 }
 0x104   :  { %v178_v9 = vpop.f32.mrb[0].mxu0 }
 0x105   :  { %v135_v10 = vadd.f32 %v178_v9, %v159_v8  ;;  %v129_v11 = vpop.f32.mrb[1].mxu0 }
 0x106   :  { %v130_v12 = vadd.f32 %v159_v8, %v129_v11 }
 0x107   :  { %140 = vst.msk [vmem:[#allocation7 + $0x8] sm:$0xff] %vm138_vm1, %v135_v10 }
 0x108   :  { %139 = vst.msk [vmem:[#allocation7] sm:$0xff] %vm138_vm1, %v130_v12 }
 0x109   :  { %247 = shalt.err (!%p244_p6)
}
 0x10a   :  { %s248_s2 = scalar_lea.hbm %s340_s3, 256 }
 0x10b   :  { %p249_p7 = scmp.ne.s32.totalorder %s340_s3, %s248_s2  ;;  %p252_p8 = scmp.lt.u32.totalorder %s248_s2, %s340_s3 }
 0x10d   :  { %p254_p9 = pnand %p252_p8, %p249_p7 }
 0x10f   :  { %257 = shalt.err (!%p254_p9)
}
 0x110   :  { %152 = dma.vmem_to_hbm [thread:$0]  %s147_s12, 256, %s340_s3, [#allocation4], %s265_s22, %s265_s22, %s266_s23  }
 0x111   :  { %262 = dma.done.wait [#allocation4], 256  }
 0x112   :  { %263 = vsyncadd [#allocation4], 4294967040 }
 0x113   :  { %156 = vsyncpa [#allocation3], 1 }
 0x114   :  { %157 = vsyncpa [#allocation6], 1 }
 0x115   :  { %158 = vsyncpa [#allocation4], 1 }

</bundles_post_ra>
